<compile_context>
chip_gen: v6e
topology: v6e:2x2x1
jax: 0.10.0
libtpu: 0.0.40
codegen_flags: <defaults>
</compile_context>

<pallas_src>
import jax
import jax.numpy as jnp
from jax.experimental import pallas as pl
from jax.experimental.pallas import tpu as pltpu

LANES = 128  # lane width / padded feature width for fc2 & fc3


def mlp_kernel(x_ref, w1_ref, b1_ref, w2_ref, b2_ref, w3_ref, b3_ref, o_ref):
    # fc1 + ReLU: (TB, 784) bf16 @ (784, 128) bf16 -> f32 accumulate on MXU.
    h1 = jnp.dot(x_ref[...], w1_ref[...], preferred_element_type=jnp.float32)
    h1 = jnp.maximum(h1 + b1_ref[...], 0.0)

    # fc2 + ReLU: (TB, 128) @ (128, 128)  (zero-padded from 64 outputs).
    h2 = jnp.dot(h1, w2_ref[...], preferred_element_type=jnp.float32)
    h2 = jnp.maximum(h2 + b2_ref[...], 0.0)

    # fc3: (TB, 128) @ (128, 128)  (zero-padded from (64, 10)); padded output
    # columns carry bias -1e30 so they vanish in the softmax denominator.
    logits = jnp.dot(h2, w3_ref[...], preferred_element_type=jnp.float32)
    logits = logits + b3_ref[...]

    # log_softmax over the full 128-wide lane axis (unmasked reductions).
    m = jnp.max(logits, axis=-1, keepdims=True)
    shifted = logits - m
    lse = jnp.log(jnp.sum(jnp.exp(shifted), axis=-1, keepdims=True))
    o_ref[...] = shifted - lse


def my_neural_net_forward(x, params, *, batch_tile=2048):
    """x: (B, 1, 28, 28) float32 (NCHW). Returns (B, 10) log-probabilities."""
    w1, b1, w2, b2, w3, b3 = params
    B = x.shape[0]

    # x.view(B, -1); bf16 halves the dominant HBM traffic (accumulation stays f32).
    x_flat = x.reshape(B, -1).astype(jnp.bfloat16)
    w1b = w1.astype(jnp.bfloat16)
    in_feat = x_flat.shape[1]

    # Pad small layers to full 128-lane width. Zero pads keep the math exact;
    # b3's pad is a large negative so padded logits contribute exp ~= 0.
    w2p = jnp.pad(w2, ((0, 0), (0, LANES - w2.shape[1])))
    b2p = jnp.pad(b2, ((0, 0), (0, LANES - b2.shape[1])))
    w3p = jnp.pad(w3, ((0, LANES - w3.shape[0]), (0, LANES - w3.shape[1])))
    b3p = jnp.pad(b3, ((0, 0), (0, LANES - b3.shape[1])), constant_values=-1e30)

    # Batch tile: whole batch when small, otherwise a sublane-aligned 2048-row
    # tile (bf16 x tile ~3.2 MB, double-buffered ~6.4 MB, + ~0.5 MB resident
    # weights + ~2 MB f32 output buffers) -> fits default scoped VMEM on
    # v5e/v6e/v7x with headroom.
    tb = B if B <= batch_tile else batch_tile
    grid = (pl.cdiv(B, tb),)

    cost = pl.CostEstimate(
        flops=2 * B * (784 * 128 + 128 * 64 + 64 * 10),
        bytes_accessed=(B * in_feat * 2 + B * LANES * 4 + w1b.size * 2
                        + (w2p.size + w3p.size + b1.size + b2p.size + b3p.size) * 4),
        transcendentals=B * 11,
    )

    streamed = lambda shape: pl.BlockSpec(shape, lambda i: (i, 0))
    resident = lambda shape: pl.BlockSpec(shape, lambda i: (0,) * len(shape))

    out_padded = pl.pallas_call(
        mlp_kernel,
        out_shape=jax.ShapeDtypeStruct((B, LANES), jnp.float32),
        grid=grid,
        in_specs=[
            streamed((tb, in_feat)),                  # x: tiled over batch
            resident(w1b.shape), resident(b1.shape),  # weights: VMEM-resident
            resident(w2p.shape), resident(b2p.shape),
            resident(w3p.shape), resident(b3p.shape),
        ],
        out_specs=streamed((tb, LANES)),
        compiler_params=pltpu.CompilerParams(
            dimension_semantics=("parallel",),
        ),
        cost_estimate=cost,
    )(x_flat, w1b, b1, w2p, b2p, w3p, b3p)

    return out_padded[:, :10]


def init_params(key):
    """Deterministic init mimicking PyTorch nn.Linear (uniform +-1/sqrt(fan_in)).

    Weights are stored as (in_features, out_features); biases as (1, out)."""
    sizes = [(784, 128), (128, 64), (64, 10)]
    params = []
    keys = jax.random.split(key, 2 * len(sizes))
    for i, (fan_in, fan_out) in enumerate(sizes):
        bound = 1.0 / (fan_in ** 0.5)
        w = jax.random.uniform(keys[2 * i], (fan_in, fan_out),
                               minval=-bound, maxval=bound, dtype=jnp.float32)
        b = jax.random.uniform(keys[2 * i + 1], (1, fan_out),
                               minval=-bound, maxval=bound, dtype=jnp.float32)
        params.extend([w, b])
    return tuple(params)


def reference_forward_f32(x, params):
    """Pure-JAX f32 reference (matches the PyTorch module)."""
    w1, b1, w2, b2, w3, b3 = params
    h = x.reshape(x.shape[0], -1)
    h = jnp.maximum(h @ w1 + b1, 0.0)
    h = jnp.maximum(h @ w2 + b2, 0.0)
    return jax.nn.log_softmax(h @ w3 + b3, axis=1)


def reference_forward_matched(x, params):
    """Same numerics as the kernel: bf16 x/W1 with f32 accumulation, rest f32."""
    w1, b1, w2, b2, w3, b3 = params
    h = x.reshape(x.shape[0], -1).astype(jnp.bfloat16)
    h = jnp.dot(h, w1.astype(jnp.bfloat16), preferred_element_type=jnp.float32)
    h = jnp.maximum(h + b1, 0.0)
    h = jnp.maximum(h @ w2 + b2, 0.0)
    return jax.nn.log_softmax(h @ w3 + b3, axis=1)


if __name__ == "__main__":
    key = jax.random.PRNGKey(0)
    k_param, k_x, k_x2 = jax.random.split(key, 3)

    params = init_params(k_param)

    # Small MNIST-like NCHW batch (single tile, grid of 1).
    x = jax.random.normal(k_x, (8, 1, 28, 28), dtype=jnp.float32)
    out = jax.block_until_ready(my_neural_net_forward(x, params))
    assert out.shape == (8, 10)
    assert jnp.allclose(out, reference_forward_matched(x, params),
                        atol=2e-3, rtol=2e-3), "mismatch vs matched reference"
    assert jnp.allclose(out, reference_forward_f32(x, params),
                        atol=7e-2, rtol=7e-2), "mismatch vs f32 reference"

    # Larger batch exercising the batch grid (3 tiles incl. a partial one).
    x2 = jax.random.normal(k_x2, (300, 1, 28, 28), dtype=jnp.float32)
    out2 = jax.block_until_ready(my_neural_net_forward(x2, params, batch_tile=128))
    assert out2.shape == (300, 10)
    assert jnp.allclose(out2, reference_forward_matched(x2, params),
                        atol=2e-3, rtol=2e-3), "mismatch vs matched reference (tiled)"

    print("KERNEL_OK")
</pallas_src>

<mosaic_0001>
module attributes {stable_mosaic.version = 11 : i64} {
  func.func @mlp_kernel(%arg0: i32, %arg1: memref<8x784xbf16, #tpu.memory_space<vmem>>, %arg2: memref<784x128xbf16, #tpu.memory_space<vmem>>, %arg3: memref<1x128xf32, #tpu.memory_space<vmem>>, %arg4: memref<128x128xf32, #tpu.memory_space<vmem>>, %arg5: memref<1x128xf32, #tpu.memory_space<vmem>>, %arg6: memref<128x128xf32, #tpu.memory_space<vmem>>, %arg7: memref<1x128xf32, #tpu.memory_space<vmem>>, %arg8: memref<8x128xf32, #tpu.memory_space<vmem>>) attributes {dimension_semantics = [#tpu.dimension_semantics<parallel>], iteration_bounds = array<i64: 1>, scalar_prefetch = 0 : i64, scratch_operands = 0 : i64, tpu.core_type = #tpu.core_type<tc>, window_params = [{transform_indices = @transform_0, window_bounds = array<i64: 8, 784>}, {pipeline_mode = #tpu.pipeline_mode<synchronous>, transform_indices = @transform_1, window_bounds = array<i64: 784, 128>}, {pipeline_mode = #tpu.pipeline_mode<synchronous>, transform_indices = @transform_2, window_bounds = array<i64: 1, 128>}, {pipeline_mode = #tpu.pipeline_mode<synchronous>, transform_indices = @transform_3, window_bounds = array<i64: 128, 128>}, {pipeline_mode = #tpu.pipeline_mode<synchronous>, transform_indices = @transform_4, window_bounds = array<i64: 1, 128>}, {pipeline_mode = #tpu.pipeline_mode<synchronous>, transform_indices = @transform_5, window_bounds = array<i64: 128, 128>}, {pipeline_mode = #tpu.pipeline_mode<synchronous>, transform_indices = @transform_6, window_bounds = array<i64: 1, 128>}, {transform_indices = @transform_7, window_bounds = array<i64: 8, 128>}]} {
    %c0 = arith.constant 0 : index
    %c0_0 = arith.constant 0 : index
    %0 = vector.load %arg1[%c0, %c0_0] : memref<8x784xbf16, #tpu.memory_space<vmem>>, vector<8x784xbf16>
    %c0_1 = arith.constant 0 : index
    %c0_2 = arith.constant 0 : index
    %1 = vector.load %arg2[%c0_1, %c0_2] : memref<784x128xbf16, #tpu.memory_space<vmem>>, vector<784x128xbf16>
    %cst = arith.constant dense<0.000000e+00> : vector<8x128xf32>
    %2 = tpu.matmul %0, %1, %cst {dimension_numbers = #tpu.dot_dimension_numbers<[1], [0], [0], [1], [0, 0, 1, 1], [], []>} : vector<8x784xbf16>, vector<784x128xbf16>, vector<8x128xf32> -> vector<8x128xf32>
    %c0_3 = arith.constant 0 : index
    %c0_4 = arith.constant 0 : index
    %3 = vector.load %arg3[%c0_3, %c0_4] : memref<1x128xf32, #tpu.memory_space<vmem>>, vector<1x128xf32>
    %4 = vector.broadcast %3 : vector<1x128xf32> to vector<8x128xf32>
    %5 = arith.addf %2, %4 : vector<8x128xf32>
    %cst_5 = arith.constant 0.000000e+00 : f32
    %6 = vector.broadcast %cst_5 : f32 to vector<8x128xf32>
    %7 = arith.maximumf %5, %6 : vector<8x128xf32>
    %c0_6 = arith.constant 0 : index
    %c0_7 = arith.constant 0 : index
    %8 = vector.load %arg4[%c0_6, %c0_7] : memref<128x128xf32, #tpu.memory_space<vmem>>, vector<128x128xf32>
    %cst_8 = arith.constant dense<0.000000e+00> : vector<8x128xf32>
    %9 = tpu.matmul %7, %8, %cst_8 {dimension_numbers = #tpu.dot_dimension_numbers<[1], [0], [0], [1], [0, 0, 1, 1], [], []>} : vector<8x128xf32>, vector<128x128xf32>, vector<8x128xf32> -> vector<8x128xf32>
    %c0_9 = arith.constant 0 : index
    %c0_10 = arith.constant 0 : index
    %10 = vector.load %arg5[%c0_9, %c0_10] : memref<1x128xf32, #tpu.memory_space<vmem>>, vector<1x128xf32>
    %11 = vector.broadcast %10 : vector<1x128xf32> to vector<8x128xf32>
    %12 = arith.addf %9, %11 : vector<8x128xf32>
    %cst_11 = arith.constant 0.000000e+00 : f32
    %13 = vector.broadcast %cst_11 : f32 to vector<8x128xf32>
    %14 = arith.maximumf %12, %13 : vector<8x128xf32>
    %c0_12 = arith.constant 0 : index
    %c0_13 = arith.constant 0 : index
    %15 = vector.load %arg6[%c0_12, %c0_13] : memref<128x128xf32, #tpu.memory_space<vmem>>, vector<128x128xf32>
    %cst_14 = arith.constant dense<0.000000e+00> : vector<8x128xf32>
    %16 = tpu.matmul %14, %15, %cst_14 {dimension_numbers = #tpu.dot_dimension_numbers<[1], [0], [0], [1], [0, 0, 1, 1], [], []>} : vector<8x128xf32>, vector<128x128xf32>, vector<8x128xf32> -> vector<8x128xf32>
    %c0_15 = arith.constant 0 : index
    %c0_16 = arith.constant 0 : index
    %17 = vector.load %arg7[%c0_15, %c0_16] : memref<1x128xf32, #tpu.memory_space<vmem>>, vector<1x128xf32>
    %18 = vector.broadcast %17 : vector<1x128xf32> to vector<8x128xf32>
    %19 = arith.addf %16, %18 : vector<8x128xf32>
    %cst_17 = arith.constant dense<0xFF800000> : vector<8xf32>
    %20 = vector.multi_reduction <maximumf>, %19, %cst_17 [1] : vector<8x128xf32> to vector<8xf32>
    %21 = vector.shape_cast %20 : vector<8xf32> to vector<8x1xf32>
    %22 = vector.broadcast %21 : vector<8x1xf32> to vector<8x128xf32>
    %23 = arith.subf %19, %22 : vector<8x128xf32>
    %24 = math.exp %23 : vector<8x128xf32>
    %cst_18 = arith.constant dense<0.000000e+00> : vector<8xf32>
    %25 = vector.multi_reduction <add>, %24, %cst_18 [1] : vector<8x128xf32> to vector<8xf32>
    %26 = vector.shape_cast %25 : vector<8xf32> to vector<8x1xf32>
    %27 = math.log %26 : vector<8x1xf32>
    %28 = vector.broadcast %27 : vector<8x1xf32> to vector<8x128xf32>
    %29 = arith.subf %23, %28 : vector<8x128xf32>
    %c0_19 = arith.constant 0 : index
    %c0_20 = arith.constant 0 : index
    %30 = vector.load %arg8[%c0_19, %c0_20] : memref<8x128xf32, #tpu.memory_space<vmem>>, vector<8x128xf32>
    tpu.vector_store %arg8[%c0_19, %c0_20], %29 {strides = array<i32>} : memref<8x128xf32, #tpu.memory_space<vmem>>, vector<8x128xf32>,
    return
  }
  func.func @transform_0(%arg0: i32) -> (i32, i32) {
    %c0_i32 = arith.constant 0 : i32
    %c0_i32_0 = arith.constant 0 : i32
    return %arg0, %c0_i32 : i32, i32
  }
  func.func @transform_1(%arg0: i32) -> (i32, i32) {
    %c0_i32 = arith.constant 0 : i32
    %c0_i32_0 = arith.constant 0 : i32
    %c0_i32_1 = arith.constant 0 : i32
    return %c0_i32, %c0_i32_0 : i32, i32
  }
  func.func @transform_2(%arg0: i32) -> (i32, i32) {
    %c0_i32 = arith.constant 0 : i32
    %c0_i32_0 = arith.constant 0 : i32
    %c0_i32_1 = arith.constant 0 : i32
    return %c0_i32, %c0_i32_0 : i32, i32
  }
  func.func @transform_3(%arg0: i32) -> (i32, i32) {
    %c0_i32 = arith.constant 0 : i32
    %c0_i32_0 = arith.constant 0 : i32
    %c0_i32_1 = arith.constant 0 : i32
    return %c0_i32, %c0_i32_0 : i32, i32
  }
  func.func @transform_4(%arg0: i32) -> (i32, i32) {
    %c0_i32 = arith.constant 0 : i32
    %c0_i32_0 = arith.constant 0 : i32
    %c0_i32_1 = arith.constant 0 : i32
    return %c0_i32, %c0_i32_0 : i32, i32
  }
  func.func @transform_5(%arg0: i32) -> (i32, i32) {
    %c0_i32 = arith.constant 0 : i32
    %c0_i32_0 = arith.constant 0 : i32
    %c0_i32_1 = arith.constant 0 : i32
    return %c0_i32, %c0_i32_0 : i32, i32
  }
  func.func @transform_6(%arg0: i32) -> (i32, i32) {
    %c0_i32 = arith.constant 0 : i32
    %c0_i32_0 = arith.constant 0 : i32
    %c0_i32_1 = arith.constant 0 : i32
    return %c0_i32, %c0_i32_0 : i32, i32
  }
  func.func @transform_7(%arg0: i32) -> (i32, i32) {
    %c0_i32 = arith.constant 0 : i32
    %c0_i32_0 = arith.constant 0 : i32
    return %arg0, %c0_i32 : i32, i32
  }
}

</mosaic_0001>

<bundles_post_ra>
// kernel: tpu_custom_call.1
= control target key start
LH: loop header
LB: loop body
LE: loop exit
PB: predicated region body
PF: predicated region fallthrough
CT: control target
= control target key end

     0   :  { %12 = vsyncpa [#allocation3], 0  ;;  %s1419_s0 = inlined_call_operand.hbm [shape: bf16[8,784], index: 0, kind: input, shape index: {}]   ;;  %s1420_s1 = inlined_call_operand.hbm [shape: bf16[784,128], index: 1, kind: input, shape index: {}]   ;;  %s1421_s2 = inlined_call_operand.vmem [shape: f32[1,128], index: 2, kind: input, shape index: {}]   ;;  %s1422_s3 = inlined_call_operand.hbm [shape: f32[128,128], index: 3, kind: input, shape index: {}]   ;;  %s1423_s4 = inlined_call_operand.vmem [shape: f32[1,128], index: 4, kind: input, shape index: {}]   ;;  %s1424_s5 = inlined_call_operand.hbm [shape: f32[128,128], index: 5, kind: input, shape index: {}]   ;;  %s1425_s6 = inlined_call_operand.vmem [shape: f32[1,128], index: 6, kind: input, shape index: {}]   ;;  %s1426_s7 = inlined_call_operand.hbm [shape: f32[8,128], index: 7, kind: output, shape index: {}]  }
   0x1   :  { %13 = vsyncpa [#allocation6], 0 }
   0x2   :  { %14 = vsyncpa [#allocation9], 0 }
   0x3   :  { %15 = vsyncpa [#allocation4], 0  ;;  %s1305_s24 = smov [#allocation5]  }
   0x4   :  { %s31_s25 = sshll.u32 %s1305_s24, 4  ;;  %s32_s25 = int_to_ptr.vmem [resolvable:$true] %s31_s25 }
   0x5   :  { %s1205_s26 = scalar_lea.vmem %s32_s25, 6272  ;;  %p1210_p1 = scmp.lt.s32.totalorder %s32_s25, %s32_s25 }
   0x6   :  { %p1206_p0 = scmp.ne.s32.totalorder %s32_s25, %s1205_s26  ;;  %p1211_p2 = scmp.lt.s32.totalorder %s1205_s26, %s1205_s26 }
   0x8   :  { %p1212_p3 = por %p1211_p2, %p1210_p1 }
   0xa   :  { %p1213_p4 = pnand %p1212_p3, %p1206_p0 }
   0xc   :  { %1216 = shalt.err (!%p1213_p4)
}
   0xd   :  { %s1306_s27 = smov 64   ;;  %s1307_s28 = smov 4  }
   0xe   :  { %37 = dma.hbm_to_vmem [thread:$0]  %s1420_s1, 6272, %s32_s25, [#allocation6], %s1306_s27, %s1306_s27, %s1307_s28  }
   0xf   :  { %s1308_s8 = smov [#allocation2]   ;;  %s1309_s10 = smov [#allocation7]  }
  0x10   :  { %s22_s9 = sshll.u32 %s1308_s8, 4  ;;  %s45_s11 = sshll.u32 %s1309_s10, 4  ;;  %s23_s9 = int_to_ptr.vmem [resolvable:$true] %s22_s9  ;;  %s46_s11 = int_to_ptr.vmem [resolvable:$true] %s45_s11 }
  0x11   :  { %s1225_s12 = scalar_lea.vmem %s23_s9, 448  ;;  %p1230_p6 = scmp.lt.s32.totalorder %s23_s9, %s23_s9 }
  0x12   :  { %p1226_p5 = scmp.ne.s32.totalorder %s23_s9, %s1225_s12  ;;  %p1231_p7 = scmp.lt.s32.totalorder %s1225_s12, %s1225_s12 }
  0x14   :  { %p1232_p8 = por %p1231_p7, %p1230_p6 }
  0x16   :  { %p1233_p9 = pnand %p1232_p8, %p1226_p5 }
  0x18   :  { %1236 = shalt.err (!%p1233_p9)
}
  0x19   :  { %25 = dma.hbm_to_vmem [thread:$0]  %s1419_s0, 448, %s23_s9, [#allocation3]  }
  0x1a   :  { %s1245_s15 = scalar_lea.vmem %s46_s11, 2048  ;;  %p1250_p11 = scmp.lt.s32.totalorder %s46_s11, %s46_s11 }
  0x1b   :  { %p1246_p10 = scmp.ne.s32.totalorder %s46_s11, %s1245_s15  ;;  %p1251_p12 = scmp.lt.s32.totalorder %s1245_s15, %s1245_s15 }
  0x1d   :  { %p1252_p13 = por %p1251_p12, %p1250_p11 }
  0x1f   :  { %p1253_p0 = pnand %p1252_p13, %p1246_p10 }
  0x21   :  { %1256 = shalt.err (!%p1253_p0)
}
  0x22   :  { %s1310_s1 = smov 128   ;;  %s1311_s16 = smov 8  }
  0x23   :  { %51 = dma.hbm_to_vmem [thread:$0]  %s1422_s3, 2048, %s46_s11, [#allocation6], %s1310_s1, %s1310_s1, %s1311_s16  }
  0x24   :  { %s1312_s19 = smov [#allocation8]  }
  0x25   :  { %s59_s20 = sshll.u32 %s1312_s19, 4  ;;  %s60_s20 = int_to_ptr.vmem [resolvable:$true] %s59_s20 }
  0x26   :  { %s1265_s21 = scalar_lea.vmem %s60_s20, 2048  ;;  %p1270_p2 = scmp.lt.s32.totalorder %s60_s20, %s60_s20 }
  0x27   :  { %p1266_p1 = scmp.ne.s32.totalorder %s60_s20, %s1265_s21  ;;  %p1271_p3 = scmp.lt.s32.totalorder %s1265_s21, %s1265_s21 }
  0x29   :  { %p1272_p4 = por %p1271_p3, %p1270_p2 }
  0x2b   :  { %p1273_p5 = pnand %p1272_p4, %p1266_p1 }
  0x2d   :  { %1276 = shalt.err (!%p1273_p5)
}
  0x2e   :  { %65 = dma.hbm_to_vmem [thread:$0]  %s1424_s5, 2048, %s60_s20, [#allocation9], %s1310_s1, %s1310_s1, %s1311_s16  }
  0x2f   :  { %1297 = dma.done.wait [#allocation3], 448  }
  0x30   :  { %1298 = vsyncadd [#allocation3], 4294966848 }
  0x31   :  { %1299 = dma.done.wait [#allocation6], 8320  }
  0x32   :  { %1300 = vsyncadd [#allocation6], 4294958976 }
  0x33   :  { %1301 = dma.done.wait [#allocation9], 2048  }
  0x34   :  { %1302 = vsyncadd [#allocation9], 4294965248  ;;  %v1137_v0 = vld [vmem:[#allocation5 + $0x78] sm:$0xff]   ;;  %v1141_v4 = vld [vmem:[#allocation5 + $0x70] sm:$0xff]   ;;  %v1313_v43 = vmov 0.0   ;;  %vm1314_vm0 = vmmov 0  }
  0x35   :  { %v1138_v1 = vld [vmem:[#allocation5 + $0x38] sm:$0xff]   ;;  %948 = vmatprep.subr.bf16.mxu0 %v1137_v0  ;;  %v1142_v5 = vld [vmem:[#allocation5 + $0x30] sm:$0xff]   ;;  %v1145_v8 = vld [vmem:[#allocation5 + $0x68] sm:$0xff]   ;;  %vm508_vm1 = vcmask 130048  }
  0x36   :  { %v1139_v2 = vld [vmem:[#allocation5 + $0xf8] sm:$0xff]   ;;  %949 = vmatpush3.bf16.msra.mxu0 %v1138_v1  ;;  %v1143_v6 = vld [vmem:[#allocation5 + $0xf0] sm:$0xff]   ;;  %v1146_v9 = vld [vmem:[#allocation5 + $0x28] sm:$0xff]  }
  0x37   :  { %v1140_v3 = vld [vmem:[#allocation5 + $0xb8] sm:$0xff]   ;;  %970 = vmatprep.subr.bf16.mxu1 %v1139_v2  ;;  %950 = vmatprep.subr.bf16.mxu0 %v1141_v4  ;;  %v1144_v7 = vld [vmem:[#allocation5 + $0xb0] sm:$0xff]   ;;  %v1147_v10 = vld [vmem:[#allocation5 + $0xe8] sm:$0xff]  }
  0x38   :  { %971 = vmatpush3.bf16.msra.mxu1 %v1140_v3  ;;  %v1148_v11 = vld [vmem:[#allocation5 + $0xa8] sm:$0xff]   ;;  %v1149_v12 = vld [vmem:[#allocation5 + $0x60] sm:$0xff]   ;;  %v1153_v16 = vld [vmem:[#allocation5 + $0x58] sm:$0xff]  }
  0x39   :  { %972 = vmatprep.subr.bf16.mxu1 %v1143_v6  ;;  %v1150_v13 = vld [vmem:[#allocation5 + $0x20] sm:$0xff]   ;;  %v1154_v17 = vld [vmem:[#allocation5 + $0x18] sm:$0xff]   ;;  %v1157_v20 = vld [vmem:[#allocation5 + $0x50] sm:$0xff]  }
  0x3a   :  { %951 = vmatpush3.bf16.msra.mxu0 %v1142_v5  ;;  %v1151_v14 = vld [vmem:[#allocation5 + $0xe0] sm:$0xff]   ;;  %v1155_v18 = vld [vmem:[#allocation5 + $0xd8] sm:$0xff]   ;;  %v1158_v21 = vld [vmem:[#allocation5 + $0x10] sm:$0xff]  }
  0x3b   :  { %952 = vmatprep.subr.bf16.mxu0 %v1145_v8  ;;  %v1152_v15 = vld [vmem:[#allocation5 + $0xa0] sm:$0xff]   ;;  %v1156_v19 = vld [vmem:[#allocation5 + $0x98] sm:$0xff]   ;;  %v1159_v22 = vld [vmem:[#allocation5 + $0xd0] sm:$0xff]  }
  0x3c   :  { %973 = vmatpush3.bf16.msra.mxu1 %v1144_v7  ;;  %v1160_v23 = vld [vmem:[#allocation5 + $0x90] sm:$0xff]   ;;  %v1161_v24 = vld [vmem:[#allocation5 + $0x48] sm:$0xff]   ;;  %v1165_v28 = vld [vmem:[#allocation5 + $0x40] sm:$0xff]  }
  0x3d   :  { %974 = vmatprep.subr.bf16.mxu1 %v1147_v10  ;;  %v1162_v25 = vld [vmem:[#allocation5 + $0x8] sm:$0xff]   ;;  %v1166_v29 = vld [vmem:[#allocation5] sm:$0xff]   ;;  %v1171_v35 = vld [vmem:[#allocation5 + $0x178] sm:$0xff]  }
  0x3e   :  { %953 = vmatpush3.bf16.msra.mxu0 %v1146_v9  ;;  %v1163_v26 = vld [vmem:[#allocation5 + $0xc8] sm:$0xff]   ;;  %v1167_v30 = vld [vmem:[#allocation5 + $0xc0] sm:$0xff]   ;;  %v1174_v39 = vld [vmem:[#allocation5 + $0x138] sm:$0xff]  }
  0x3f   :  { %954 = vmatprep.subr.bf16.mxu0 %v1149_v12  ;;  %v1164_v27 = vld [vmem:[#allocation5 + $0x88] sm:$0xff]   ;;  %v1170_v34 = vld [vmem:[#allocation5 + $0x80] sm:$0xff]   ;;  %v1175_v40 = vld [vmem:[#allocation5 + $0x170] sm:$0xff]  }
  0x40   :  { %975 = vmatpush3.bf16.msra.mxu1 %v1148_v11  ;;  %v81_v31 = vld [vmem:[#allocation2] sm:$0xff]  ;;  %v82_v36 = vld [vmem:[#allocation2 + $0x8] sm:$0xff]  ;;  %v1181_v47 = vld [vmem:[#allocation5 + $0x158] sm:$0xff]  }
  0x41   :  { %976 = vmatprep.subr.bf16.mxu1 %v1151_v14  ;;  %v889_v32 = vcombine.low %v81_v31, %v81_v31  ;;  %v890_v33 = vcombine.high %v81_v31, %v81_v31  ;;  %v891_v37 = vcombine.low %v82_v36, %v82_v36  ;;  %v892_v38 = vcombine.high %v82_v36, %v82_v36  ;;  %v1176_v41 = vld [vmem:[#allocation5 + $0x130] sm:$0xff]   ;;  %v1177_v42 = vld [vmem:[#allocation5 + $0x168] sm:$0xff]   ;;  %v1179_v45 = vld [vmem:[#allocation5 + $0x160] sm:$0xff]  }
  0x42   :  { %955 = vmatpush3.bf16.msra.mxu0 %v1150_v13  ;;  %v1178_v44 = vld [vmem:[#allocation5 + $0x128] sm:$0xff]   ;;  %v1180_v46 = vld [vmem:[#allocation5 + $0x120] sm:$0xff]   ;;  %v1182_v48 = vld [vmem:[#allocation5 + $0x118] sm:$0xff]  }
  0x43   :  { %956 = vmatprep.subr.bf16.mxu0 %v1153_v16  ;;  %544 = vmatprep.mubr.bf16.mxu0 %v890_v33  ;;  %v1183_v49 = vld [vmem:[#allocation5 + $0x150] sm:$0xff]   ;;  %v1189_v50 = vld [vmem:[#allocation5 + $0x180] sm:$0xff]   ;;  %v1192_v53 = vld [vmem:[#allocation2 + $0x18] ss:$0 sps:$4 sm:$0xff]  }
  0x44   :  { %977 = vmatpush3.bf16.msra.mxu1 %v1152_v15  ;;  %584 = vmatprep.mubr.bf16.mxu1 %v892_v38  ;;  %v83_v51 = vld [vmem:[#allocation2 + $0x10] sm:$0xff]  ;;  %v1185_v55 = vld [vmem:[#allocation5 + $0x148] sm:$0xff]   ;;  %v1187_v57 = vld [vmem:[#allocation5 + $0x140] sm:$0xff]  }
  0x45   :  { %978 = vmatprep.subr.bf16.mxu1 %v1155_v18  ;;  %v894_v52 = vcombine.high %v83_v51, %v83_v51  ;;  %v1184_v54 = vld [vmem:[#allocation5 + $0x110] sm:$0xff]   ;;  %v1186_v56 = vld [vmem:[#allocation5 + $0x108] sm:$0xff]   ;;  %v1188_v58 = vld [vmem:[#allocation5 + $0x100] sm:$0xff]   ;;  %v893_v59 = vcombine.low %v83_v51, %v83_v51 }
  0x46   :  { %957 = vmatpush3.bf16.msra.mxu0 %v1154_v17  ;;  %v688_v60 = vld [vmem:[#allocation7 + $0x78] sm:$0xff]  ;;  %v687_v61 = vld [vmem:[#allocation7 + $0x70] sm:$0xff]  ;;  %v686_v62 = vld [vmem:[#allocation7 + $0x68] sm:$0xff] }
  0x47   :  { %958 = vmatprep.subr.bf16.mxu0 %v1157_v20  ;;  %v685_v63 = vld [vmem:[#allocation7 + $0x60] sm:$0xff]  ;;  %v684_v0 = vld [vmem:[#allocation7 + $0x58] sm:$0xff]  ;;  %v683_v1 = vld [vmem:[#allocation7 + $0x50] sm:$0xff] }
  0x48   :  { %979 = vmatpush3.bf16.msra.mxu1 %v1156_v19  ;;  %v682_v2 = vld [vmem:[#allocation7 + $0x48] sm:$0xff]  ;;  %v681_v3 = vld [vmem:[#allocation7 + $0x40] sm:$0xff]  ;;  %v680_v4 = vld [vmem:[#allocation7 + $0x38] sm:$0xff] }
  0x49   :  { %980 = vmatprep.subr.bf16.mxu1 %v1159_v22  ;;  %v679_v5 = vld [vmem:[#allocation7 + $0x30] sm:$0xff]  ;;  %v678_v6 = vld [vmem:[#allocation7 + $0x28] sm:$0xff]  ;;  %v677_v7 = vld [vmem:[#allocation7 + $0x20] sm:$0xff] }
  0x4a   :  { %959 = vmatpush3.bf16.msra.mxu0 %v1158_v21  ;;  %v676_v8 = vld [vmem:[#allocation7 + $0x18] sm:$0xff]  ;;  %v675_v9 = vld [vmem:[#allocation7 + $0x10] sm:$0xff]  ;;  %v674_v10 = vld [vmem:[#allocation7 + $0x8] sm:$0xff] }
  0x4b   :  { %960 = vmatprep.subr.bf16.mxu0 %v1161_v24  ;;  %v673_v11 = vld [vmem:[#allocation7] sm:$0xff]  ;;  %v782_v12 = vld [vmem:[#allocation8 + $0x78] sm:$0xff]  ;;  %v781_v13 = vld [vmem:[#allocation8 + $0x70] sm:$0xff] }
  0x4c   :  { %981 = vmatpush3.bf16.msra.mxu1 %v1160_v23  ;;  %v780_v14 = vld [vmem:[#allocation8 + $0x68] sm:$0xff]  ;;  %v779_v15 = vld [vmem:[#allocation8 + $0x60] sm:$0xff]  ;;  %v778_v16 = vld [vmem:[#allocation8 + $0x58] sm:$0xff] }
  0x4d   :  { %982 = vmatprep.subr.bf16.mxu1 %v1163_v26  ;;  %v777_v17 = vld [vmem:[#allocation8 + $0x50] sm:$0xff]  ;;  %v776_v18 = vld [vmem:[#allocation8 + $0x48] sm:$0xff]  ;;  %v775_v19 = vld [vmem:[#allocation8 + $0x40] sm:$0xff] }
  0x4e   :  { %961 = vmatpush3.bf16.msra.mxu0 %v1162_v25  ;;  %v774_v20 = vld [vmem:[#allocation8 + $0x38] sm:$0xff]  ;;  %v773_v21 = vld [vmem:[#allocation8 + $0x30] sm:$0xff]  ;;  %v772_v22 = vld [vmem:[#allocation8 + $0x28] sm:$0xff] }
  0x4f   :  { %962 = vmatprep.subr.bf16.mxu0 %v1165_v28  ;;  %v771_v23 = vld [vmem:[#allocation8 + $0x20] sm:$0xff]  ;;  %v770_v24 = vld [vmem:[#allocation8 + $0x18] sm:$0xff]  ;;  %v769_v51 = vld [vmem:[#allocation8 + $0x10] sm:$0xff] }
  0x50   :  { %983 = vmatpush3.bf16.msra.mxu1 %v1164_v27  ;;  %v888_v38 = vld [vmem:[%s1421_s2] ss:$0 sm:$0xff] }
  0x51   :  { %984 = vmatprep.subr.bf16.mxu1 %v1167_v30 }
  0x52   :  { %963 = vmatpush3.bf16.msra.mxu0 %v1166_v29 }
  0x53   :  { %992 = vmatprep.subr.bf16.mxu0 %v1171_v35 }
  0x54   :  { %985 = vmatpush3.bf16.msra.mxu1 %v1170_v34 }
  0x55   :  { %545 = vmatmul.mubr.bf16.vlgmr.msra.gmra.mxu0 %v889_v32  ;;  %1050 = vmatprep.subr.bf16.mxu1 %v1313_v43 }
  0x56   :  { %993 = vmatpush3.bf16.msra.mxu0 %v1174_v39  ;;  %624 = vmatprep.mubr.bf16.mxu0 %v894_v52  ;;  %v768_v52 = vld [vmem:[#allocation8 + $0x8] sm:$0xff] }
  0x57   :  { %585 = vmatmul.mubr.bf16.vlgmr.msra.gmra.mxu1 %v891_v37  ;;  %994 = vmatprep.subr.bf16.mxu0 %v1175_v40 }
  0x58   :  { %1052 = vmatprep.mubr.msk.bf16.mxu1 %vm1314_vm0, %v1313_v43  ;;  %1051 = vmatpush3.bf16.msra.mxu1 %v1189_v50 }
  0x59   :  { %1056 = vmatprep.subr.mxu1 %v1313_v43 }
  0x5a   :  { %995 = vmatpush3.bf16.msra.mxu0 %v1176_v41 }
  0x5b   :  { %996 = vmatprep.subr.bf16.mxu0 %v1177_v42 }
  0x5e   :  { %997 = vmatpush3.bf16.msra.mxu0 %v1178_v44 }
  0x5f   :  { %998 = vmatprep.subr.bf16.mxu0 %v1179_v45  ;;  %1053 = vmatmul.mubr.msk.bf16.vlgmr.msra.gmra.mxu1 %vm508_vm1, %v1192_v53  ;;  %v767_v53 = vld [vmem:[#allocation8] sm:$0xff] }
  0x60   :  { %1088 = vmatprep.mubr.msk.f32.mxu1 %vm1314_vm0, %v1313_v43  ;;  %1057 = vmatpush3.msra.mxu1 %v688_v60 }
  0x61   :  { %1058 = vmatprep.subr.mxu1 %v1313_v43 }
  0x62   :  { %999 = vmatpush3.bf16.msra.mxu0 %v1180_v46  ;;  %1059 = vmatpush3.msra.mxu1 %v687_v61 }
  0x63   :  { %1000 = vmatprep.subr.bf16.mxu0 %v1181_v47  ;;  %1060 = vmatprep.subr.mxu1 %v1313_v43 }
  0x64   :  { %1061 = vmatpush3.msra.mxu1 %v686_v62 }
  0x65   :  { %1062 = vmatprep.subr.mxu1 %v1313_v43 }
  0x66   :  { %1001 = vmatpush3.bf16.msra.mxu0 %v1182_v48  ;;  %1063 = vmatpush3.msra.mxu1 %v685_v63 }
  0x67   :  { %1002 = vmatprep.subr.bf16.mxu0 %v1183_v49  ;;  %1064 = vmatprep.subr.mxu1 %v1313_v43 }
  0x68   :  { %1065 = vmatpush3.msra.mxu1 %v684_v0 }
  0x69   :  { %1066 = vmatprep.subr.mxu1 %v1313_v43 }
  0x6a   :  { %1003 = vmatpush3.bf16.msra.mxu0 %v1184_v54  ;;  %1067 = vmatpush3.msra.mxu1 %v683_v1  ;;  %v946_v54 = vld [vmem:[%s1423_s4] ss:$0 sm:$0xff]  ;;  %s1315_s4 = smov [#allocation10]  }
  0x6b   :  { %1004 = vmatprep.subr.bf16.mxu0 %v1185_v55  ;;  %1068 = vmatprep.subr.mxu1 %v1313_v43  ;;  %s877_s26 = sshll.u32 %s1315_s4, 4  ;;  %s878_s26 = int_to_ptr.vmem [resolvable:$true] %s877_s26 }
  0x6c   :  { %1069 = vmatpush3.msra.mxu1 %v682_v2  ;;  %p1282_p7 = scmp.lt.s32.totalorder %s878_s26, %s878_s26 }
  0x6d   :  { %1070 = vmatprep.subr.mxu1 %v1313_v43 }
  0x6e   :  { %1005 = vmatpush3.bf16.msra.mxu0 %v1186_v56  ;;  %1071 = vmatpush3.msra.mxu1 %v681_v3 }
  0x6f   :  { %1006 = vmatprep.subr.bf16.mxu0 %v1187_v57  ;;  %1072 = vmatprep.subr.mxu1 %v1313_v43 }
  0x70   :  { %1073 = vmatpush3.msra.mxu1 %v680_v4 }
  0x71   :  { %1074 = vmatprep.subr.mxu1 %v1313_v43 }
  0x72   :  { %1007 = vmatpush3.bf16.msra.mxu0 %v1188_v58  ;;  %1075 = vmatpush3.msra.mxu1 %v679_v5 }
  0x73   :  { %1091 = vmatprep.subr.mxu0 %v1313_v43  ;;  %1076 = vmatprep.subr.mxu1 %v1313_v43 }
  0x74   :  { %1077 = vmatpush3.msra.mxu1 %v678_v6 }
  0x75   :  { %625 = vmatmul.mubr.bf16.vlgmr.msra.gmra.mxu0 %v893_v59  ;;  %1078 = vmatprep.subr.mxu1 %v1313_v43  ;;  %v947_v59 = vld [vmem:[%s1425_s6] ss:$0 sm:$0xff]  ;;  %s1277_s6 = scalar_lea.vmem %s878_s26, 128 }
  0x76   :  { %1123 = vmatprep.mubr.msk.f32.mxu0 %vm1314_vm0, %v1313_v43  ;;  %1079 = vmatpush3.msra.mxu1 %v677_v7  ;;  %p1278_p6 = scmp.ne.s32.totalorder %s878_s26, %s1277_s6  ;;  %p1283_p8 = scmp.lt.s32.totalorder %s1277_s6, %s1277_s6 }
  0x77   :  { %1080 = vmatprep.subr.mxu1 %v1313_v43  ;;  %1092 = vmatpush3.msra.mxu0 %v782_v12 }
  0x78   :  { %1081 = vmatpush3.msra.mxu1 %v676_v8  ;;  %1093 = vmatprep.subr.mxu0 %v1313_v43  ;;  %p1284_p9 = por %p1283_p8, %p1282_p7 }
  0x79   :  { %1082 = vmatprep.subr.mxu1 %v1313_v43  ;;  %1094 = vmatpush3.msra.mxu0 %v781_v13 }
  0x7a   :  { %1083 = vmatpush3.msra.mxu1 %v675_v9  ;;  %1095 = vmatprep.subr.mxu0 %v1313_v43  ;;  %p1285_p10 = pnand %p1284_p9, %p1278_p6 }
  0x7b   :  { %1084 = vmatprep.subr.mxu1 %v1313_v43  ;;  %1096 = vmatpush3.msra.mxu0 %v780_v14 }
  0x7c   :  { %1085 = vmatpush3.msra.mxu1 %v674_v10  ;;  %1097 = vmatprep.subr.mxu0 %v1313_v43 }
  0x7d   :  { %1086 = vmatprep.subr.mxu1 %v1313_v43  ;;  %1098 = vmatpush3.msra.mxu0 %v779_v15 }
  0x7e   :  { %1087 = vmatpush3.msra.mxu1 %v673_v11  ;;  %1099 = vmatprep.subr.mxu0 %v1313_v43 }
  0x7f   :  { %1100 = vmatpush3.msra.mxu0 %v778_v16 }
  0x80   :  { %1101 = vmatprep.subr.mxu0 %v1313_v43 }
  0x81   :  { %1102 = vmatpush3.msra.mxu0 %v777_v17 }
  0x82   :  { %1103 = vmatprep.subr.mxu0 %v1313_v43 }
  0x83   :  { %1104 = vmatpush3.msra.mxu0 %v776_v18 }
  0x84   :  { %1105 = vmatprep.subr.mxu0 %v1313_v43 }
  0x85   :  { %1106 = vmatpush3.msra.mxu0 %v775_v19 }
  0x86   :  { %1107 = vmatprep.subr.mxu0 %v1313_v43 }
  0x87   :  { %1108 = vmatpush3.msra.mxu0 %v774_v20 }
  0x88   :  { %1109 = vmatprep.subr.mxu0 %v1313_v43 }
  0x89   :  { %1110 = vmatpush3.msra.mxu0 %v773_v21 }
  0x8a   :  { %1111 = vmatprep.subr.mxu0 %v1313_v43 }
  0x8b   :  { %1112 = vmatpush3.msra.mxu0 %v772_v22 }
  0x8c   :  { %1113 = vmatprep.subr.mxu0 %v1313_v43 }
  0x8d   :  { %1114 = vmatpush3.msra.mxu0 %v771_v23 }
  0x8e   :  { %1115 = vmatprep.subr.mxu0 %v1313_v43 }
  0x8f   :  { %1116 = vmatpush3.msra.mxu0 %v770_v24 }
  0x90   :  { %1117 = vmatprep.subr.mxu0 %v1313_v43 }
  0x91   :  { %1118 = vmatpush3.msra.mxu0 %v769_v51 }
  0x92   :  { %1119 = vmatprep.subr.mxu0 %v1313_v43 }
  0x93   :  { %1120 = vmatpush3.msra.mxu0 %v768_v52 }
  0x94   :  { %1121 = vmatprep.subr.mxu0 %v1313_v43 }
  0x95   :  { %1122 = vmatpush3.msra.mxu0 %v767_v53 }
 0x115   :  { %v964_v25 = vpop.f32.mrf.mxu0 }
 0x117   :  { %v965_v26 = vpop.f32.mrf.mxu0  ;;  %v986_v27 = vpop.f32.mrf.mxu1 }
 0x118   :  { %v966_v37 = vadd.f32 %v965_v26, %v964_v25 }
 0x119   :  { %v967_v28 = vpop.f32.mrf.mxu0  ;;  %v987_v29 = vpop.f32.mrf.mxu1 }
 0x11a   :  { %v547_v39 = vadd.f32 %v966_v37, %v888_v38  ;;  %v988_v40 = vadd.f32 %v987_v29, %v986_v27 }
 0x11b   :  { %v968_v30 = vpop.f32.mrf.mxu0  ;;  %v989_v31 = vpop.f32.mrf.mxu1 }
 0x11c   :  { %v587_v44 = vadd.f32 %v988_v40, %v547_v39 }
 0x11d   :  { %v990_v32 = vpop.f32.mrf.mxu1 }
 0x11f   :  { %v666_v33 = vpop.f32.mrf.mxu1 }
 0x121   :  { %v1054_v34 = vpop.f32.mrf.mxu1 }
 0x123   :  { %v669_v35 = vpop.f32.mrf.mxu1 }
 0x125   :  { %v1055_v36 = vpop.f32.mrf.mxu1 }
 0x135   :  { %v1008_v41 = vpop.f32.mrf.mxu0 }
 0x137   :  { %v1009_v42 = vpop.f32.mrf.mxu0 }
 0x138   :  { %v1010_v45 = vadd.f32 %v1009_v42, %v1008_v41 }
 0x139   :  { %v1011_v46 = vpop.f32.mrf.mxu0 }
 0x13a   :  { %v627_v47 = vadd.f32 %v1010_v45, %v587_v44 }
 0x13b   :  { %v1012_v48 = vpop.f32.mrf.mxu0 }
 0x13c   :  { %v667_v49 = vadd.f32 %v666_v33, %v627_v47 }
 0x13e   :  { %v672_v50 = vmax.f32 %v667_v49, 0.0 }
 0x140   :  { %1089 = vmatmul.mubr.f32.vlgmr.msra.gmra.mxu1 %v672_v50 }
 0x200   :  { %v762_v55 = vpop.f32.mrf.mxu1 }
 0x201   :  { %v763_v56 = vadd.f32 %v946_v54, %v762_v55 }
 0x202   :  { %v1090_v57 = vpop.f32.mrf.mxu1 }
 0x203   :  { %v766_v58 = vmax.f32 %v763_v56, 0.0 }
 0x205   :  { %1124 = vmatmul.mubr.f32.vlgmr.msra.gmra.mxu0 %v766_v58 }
 0x2c5   :  { %v856_v60 = vpop.f32.mrf.mxu0 }
 0x2c6   :  { %v857_v61 = vadd.f32 %v947_v59, %v856_v60 }
 0x2c7   :  { %v1125_v62 = vpop.f32.mrf.mxu0 }
 0x2c8   :  { %860 = vmax.xlane.f32.xlu0 %v857_v61 }
 0x351   :  { %v861_v43 = vpop.xlane.xlu0 %860 }
 0x352   :  { %v862_v63 = vsub.f32 %v857_v61, %v861_v43 }
 0x354   :  { %v863_v0 = vmul.f32 1.442695, %v862_v63 }
 0x356   :  { %1193 = vpow2.f32 %v863_v0 }
 0x363   :  { %v1194_v1 = vpop.eup %1193 }
 0x364   :  { %865 = vadd.xlane.f32.xlu0 %v1194_v1 }
 0x3ed   :  { %v866_v2 = vpop.xlane.xlu0 %865 }
 0x3ee   :  { %1195 = vlog2.f32 %v866_v2 }
 0x3fb   :  { %v1196_v3 = vpop.eup %1195 }
 0x3fc   :  { %v868_v4 = vmul.f32 0.6931472, %v1196_v3 }
 0x3fe   :  { %v869_v5 = vsub.f32 %v862_v63, %v868_v4 }
 0x400   :  { %870 = vst [vmem:[#allocation10] sm:$0xff] %v869_v5 }
 0x401   :  { %1288 = shalt.err (!%p1285_p10)
}
 0x402   :  { %880 = dma.vmem_to_hbm [thread:$0]  %s878_s26, 128, %s1426_s7, [#allocation4]  }
 0x403   :  { %1303 = dma.done.wait [#allocation4], 128  }
 0x404   :  { %1304 = vsyncadd [#allocation4], 4294967168 }
 0x405   :  { %884 = vsyncpa [#allocation3], 1 }
 0x406   :  { %885 = vsyncpa [#allocation6], 1 }
 0x407   :  { %886 = vsyncpa [#allocation9], 1 }
 0x408   :  { %887 = vsyncpa [#allocation4], 1 }

</bundles_post_ra>
